<compile_context>
chip_gen: v7x
topology: tpu7x:2x2x1
jax: 0.10.0
libtpu: 0.0.40
codegen_flags: <defaults>
</compile_context>

<pallas_src>
import jax
import jax.numpy as jnp
from jax.experimental import pallas as pl
from jax.experimental.pallas import tpu as pltpu


def _round_up(v, m):
    return ((v + m - 1) // m) * m


def _linear_kernel(x_ref, w_ref, b_ref, o_ref):
    # MXU matmul with f32 accumulation, f32 bias add on the VPU, cast on store.
    acc = jnp.dot(x_ref[...], w_ref[...], preferred_element_type=jnp.float32)
    o_ref[...] = (acc + b_ref[...]).astype(o_ref.dtype)


def _linear_pallas(x, w_t, b, num_classes, out_dtype, *, max_tile_n=1024):
    """Compute x:(N,C) @ w_t:(C,K_pad) + b:(1,K_pad), return (N, num_classes)."""
    n, c = x.shape
    k_pad = w_t.shape[1]

    # Row tile: large (512-1024) for HBM-roofline efficiency, multiple of 8 for
    # sublane alignment, but capped so the grid has >= 2 steps whenever possible
    # (v7x megacore sharding across its 2 TensorCores).
    tile_n = min(max_tile_n, _round_up(max(n, 8), 8))
    if n > 8:
        two_step = max(_round_up(pl.cdiv(n, 2), 8), 8)
        tile_n = min(tile_n, two_step)

    # Double-buffered x/out tiles + (double-buffered) resident weight + bias.
    x_item = jnp.dtype(x.dtype).itemsize
    o_item = jnp.dtype(out_dtype).itemsize
    w_item = jnp.dtype(w_t.dtype).itemsize

    def footprint(t):
        return (2 * t * c * x_item
                + 2 * t * k_pad * o_item
                + 2 * c * k_pad * w_item
                + 2 * k_pad * 4)

    vmem_cap = 32 << 20  # safe headroom on v7x (64 MiB/TC); trivial for v5e/v6e
    while footprint(tile_n) > vmem_cap - (2 << 20) and tile_n > 8:
        tile_n = max(8, _round_up(tile_n // 2, 8))
    vmem_bytes = int(min(max(footprint(tile_n) + (2 << 20), 8 << 20), vmem_cap))

    grid = (pl.cdiv(n, tile_n),)

    out = pl.pallas_call(
        _linear_kernel,
        out_shape=jax.ShapeDtypeStruct((n, k_pad), out_dtype),
        grid_spec=pltpu.PrefetchScalarGridSpec(
            num_scalar_prefetch=0,
            grid=grid,
            in_specs=[
                pl.BlockSpec((tile_n, c), lambda i: (i, 0)),   # x streams over N
                pl.BlockSpec((c, k_pad), lambda i: (0, 0)),    # weight resident
                pl.BlockSpec((1, k_pad), lambda i: (0, 0)),    # bias resident
            ],
            out_specs=pl.BlockSpec((tile_n, k_pad), lambda i: (i, 0)),
        ),
        compiler_params=pltpu.CompilerParams(
            dimension_semantics=("parallel",),   # shard row tiles across TCs (v7x)
            vmem_limit_bytes=vmem_bytes,
        ),
    )(x, w_t, b)

    if k_pad != num_classes:
        out = out[:, :num_classes]
    return out


class FastRCNNPredictorPallas:
    """Pallas-TPU port of FastRCNNPredictor: forward(x) = cls_score(x)."""

    def __init__(self, weight, bias, *, compute_dtype=None, max_tile_n=1024):
        # torch.nn.Linear layout: weight (num_classes, in_channels), bias (num_classes,)
        self.num_classes, self.in_channels = weight.shape
        self.compute_dtype = compute_dtype
        self.max_tile_n = max_tile_n

        k_pad = _round_up(max(self.num_classes, 1), 128)
        w_dtype = compute_dtype if compute_dtype is not None else weight.dtype
        # Hoisted once at init (not per forward): transpose to (C, K) and pad K
        # up to a lane-dense multiple of 128. Bias stays f32 (added post-acc).
        self.w_t = jnp.pad(
            weight.T.astype(w_dtype), ((0, 0), (0, k_pad - self.num_classes))
        )
        self.b = jnp.pad(
            bias.astype(jnp.float32), (0, k_pad - self.num_classes)
        ).reshape(1, k_pad)

    def __call__(self, x):
        out_dtype = x.dtype
        if self.compute_dtype is not None:
            x = x.astype(self.compute_dtype)
        return _linear_pallas(
            x, self.w_t, self.b, self.num_classes, out_dtype,
            max_tile_n=self.max_tile_n,
        )


if __name__ == "__main__":
    # Small but non-degenerate shapes consistent with FastRCNNPredictor:
    # N ROI features of dimension in_channels -> num_classes scores.
    batch = 64
    in_channels = 128
    num_classes = 16

    key = jax.random.PRNGKey(0)
    kx, kw, kb = jax.random.split(key, 3)

    bound = 1.0 / (in_channels ** 0.5)
    weight = jax.random.uniform(
        kw, (num_classes, in_channels), jnp.float32, minval=-bound, maxval=bound
    )  # torch layout (out_features, in_features)
    bias = jax.random.uniform(
        kb, (num_classes,), jnp.float32, minval=-bound, maxval=bound
    )
    x = jax.random.normal(kx, (batch, in_channels), jnp.float32)

    ref = x @ weight.T + bias

    # f32 path (exact vs. reference).
    predictor = FastRCNNPredictorPallas(weight, bias)
    out = jax.block_until_ready(predictor(x))
    assert out.shape == (batch, num_classes)
    assert out.dtype == x.dtype
    assert jnp.allclose(out, ref, atol=1e-5, rtol=1e-5)

    # bf16 fast path: halves the dominant x HBM stream, keeps f32 accumulation.
    predictor_bf16 = FastRCNNPredictorPallas(weight, bias, compute_dtype=jnp.bfloat16)
    out_bf16 = jax.block_until_ready(predictor_bf16(x))
    assert out_bf16.shape == (batch, num_classes)
    assert jnp.allclose(out_bf16.astype(jnp.float32), ref, atol=2e-2, rtol=2e-2)

    print("KERNEL_OK")
</pallas_src>

<mosaic_0001>
module attributes {stable_mosaic.version = 11 : i64} {
  func.func @_linear_kernel(%arg0: i32, %arg1: memref<32x128xf32, #tpu.memory_space<vmem>>, %arg2: memref<128x128xf32, #tpu.memory_space<vmem>>, %arg3: memref<1x128xf32, #tpu.memory_space<vmem>>, %arg4: memref<32x128xf32, #tpu.memory_space<vmem>>) attributes {dimension_semantics = [#tpu.dimension_semantics<parallel>], iteration_bounds = array<i64: 2>, scalar_prefetch = 0 : i64, scratch_operands = 0 : i64, tpu.core_type = #tpu.core_type<tc>, window_params = [{transform_indices = @transform_0, window_bounds = array<i64: 32, 128>}, {pipeline_mode = #tpu.pipeline_mode<synchronous>, transform_indices = @transform_1, window_bounds = array<i64: 128, 128>}, {pipeline_mode = #tpu.pipeline_mode<synchronous>, transform_indices = @transform_2, window_bounds = array<i64: 1, 128>}, {transform_indices = @transform_3, window_bounds = array<i64: 32, 128>}]} {
    %c0 = arith.constant 0 : index
    %c0_0 = arith.constant 0 : index
    %0 = vector.load %arg1[%c0, %c0_0] : memref<32x128xf32, #tpu.memory_space<vmem>>, vector<32x128xf32>
    %c0_1 = arith.constant 0 : index
    %c0_2 = arith.constant 0 : index
    %1 = vector.load %arg2[%c0_1, %c0_2] : memref<128x128xf32, #tpu.memory_space<vmem>>, vector<128x128xf32>
    %cst = arith.constant dense<0.000000e+00> : vector<32x128xf32>
    %2 = tpu.matmul %0, %1, %cst {dimension_numbers = #tpu.dot_dimension_numbers<[1], [0], [0], [1], [0, 0, 1, 1], [], []>} : vector<32x128xf32>, vector<128x128xf32>, vector<32x128xf32> -> vector<32x128xf32>
    %c0_3 = arith.constant 0 : index
    %c0_4 = arith.constant 0 : index
    %3 = vector.load %arg3[%c0_3, %c0_4] : memref<1x128xf32, #tpu.memory_space<vmem>>, vector<1x128xf32>
    %4 = vector.broadcast %3 : vector<1x128xf32> to vector<32x128xf32>
    %5 = arith.addf %2, %4 : vector<32x128xf32>
    %c0_5 = arith.constant 0 : index
    %c0_6 = arith.constant 0 : index
    %6 = vector.load %arg4[%c0_5, %c0_6] : memref<32x128xf32, #tpu.memory_space<vmem>>, vector<32x128xf32>
    tpu.vector_store %arg4[%c0_5, %c0_6], %5 {strides = array<i32>} : memref<32x128xf32, #tpu.memory_space<vmem>>, vector<32x128xf32>,
    return
  }
  func.func @transform_0(%arg0: i32) -> (i32, i32) {
    %c0_i32 = arith.constant 0 : i32
    %c0_i32_0 = arith.constant 0 : i32
    return %arg0, %c0_i32 : i32, i32
  }
  func.func @transform_1(%arg0: i32) -> (i32, i32) {
    %c0_i32 = arith.constant 0 : i32
    %c0_i32_0 = arith.constant 0 : i32
    %c0_i32_1 = arith.constant 0 : i32
    return %c0_i32, %c0_i32_0 : i32, i32
  }
  func.func @transform_2(%arg0: i32) -> (i32, i32) {
    %c0_i32 = arith.constant 0 : i32
    %c0_i32_0 = arith.constant 0 : i32
    %c0_i32_1 = arith.constant 0 : i32
    return %c0_i32, %c0_i32_0 : i32, i32
  }
  func.func @transform_3(%arg0: i32) -> (i32, i32) {
    %c0_i32 = arith.constant 0 : i32
    %c0_i32_0 = arith.constant 0 : i32
    return %arg0, %c0_i32 : i32, i32
  }
}

</mosaic_0001>

<bundles_post_ra>
// kernel: tpu_custom_call.1
= control target key start
LH: loop header
LB: loop body
LE: loop exit
PB: predicated region body
PF: predicated region fallthrough
CT: control target
= control target key end

     0   :  { %8 = vsyncpa [#allocation3], 0  ;;  %s982_s0 = inlined_call_operand.hbm [shape: f32[64,128], index: 0, kind: input, shape index: {}]   ;;  %s983_s1 = inlined_call_operand.hbm [shape: f32[128,128], index: 1, kind: input, shape index: {}]   ;;  %s984_s2 = inlined_call_operand.vmem [shape: f32[1,128], index: 2, kind: input, shape index: {}]   ;;  %s985_s3 = inlined_call_operand.hbm [shape: f32[64,128], index: 3, kind: output, shape index: {}]  }
   0x1   :  { %10 = vsyncpa [#allocation3 + $0x1], 0 }
   0x2   :  { %11 = vsyncpa [#allocation6], 0 }
   0x3   :  { %12 = vsyncpa [#allocation4], 0 }
   0x4   :  { %14 = vsyncpa [#allocation4 + $0x1], 0  ;;  %s762_s12 = smov 0   ;;  %s764_s13 = smov 0  }
   0x5   :  { %s766_s14 = smov 0   ;;  %s768_s15 = smov 0  }
   0x6 LB: > { %s783_s16 = sadd.s32 4294967295, %s733_s15   ;;  %s419_s17 = sadd.s32 4294967294, %s733_s15   ;;  %s733_s15 = sphi %s768_s15, %s1005_s15   ;;  %s729_s14 = sphi %s766_s14, %s1004_s14   ;;  %s725_s13 = sphi %s764_s13, %s1003_s13   ;;  %s721_s12 = sphi %s762_s12, %s1002_s12  }
   0x7   : > { %p40_p0 = scmp.ne.s32.totalorder %s725_s13, %s721_s12  ;;  %p986_p1 = scmp.eq.s32.totalorder %s783_s16, 0 }
   0x8   : > { %p112_p3 = scmp.eq.s32.totalorder %s419_s17, 1  ;;  %p420_p5 = scmp.ge.s32.totalorder %s733_s15, 1 }
   0x9   : > { %p792_p4 = por %p986_p1, %p40_p0  ;;  %p119_p7 = scmp.lt.s32.totalorder %s733_s15, 3 }
   0xa   : > { %p797_p6 = por %p112_p3, %p40_p0  ;;  %s735_s21 = smov [#allocation5]  }
   0xb   : > { %s989_s18 = scalar_select %p792_p4, 1, 0 }
   0xc   : > { %s990_s19 = scalar_select %p797_p6, 1, 0 }
   0xd   : > { %p802_p8 = pnand %p420_p5, %p119_p7  ;;  %s131_s22 = sshll.u32 %s735_s21, 4  ;;  %s806_s22 = int_to_ptr.vmem [resolvable:$true] %s131_s22 }
   0xe   : > { %s818_s24 = sadd.s32 1, %s733_s15   ;;  %s27_s25 = sadd.s32 1, %s729_s14 }
   0xf   : > { %s991_s20 = scalar_select %p802_p8, 1, 0 }
  0x10   : > { %p552_p9 = pneg %p802_p8  ;;  %s24_s26 = ssub.s32 %s733_s15, %s818_s24 }
  0x11   : > { %s605_s29 = scalar_lea.hbm %s983_s1, 2048 }
  0x12   : > { %p813_p11 = pnand %p552_p9, %p986_p1  ;;  %p606_p12 = scmp.ne.s32.totalorder %s983_s1, %s605_s29 }
  0x13   : > { %p612_p5 = scmp.lt.u32.totalorder %s605_s29, %s983_s1 }
  0x14   : > { %p607_p13 = pneg %p813_p11 }
  0x16   : > { %p608_p0 = pnand %p607_p13, %p606_p12 }
  0x18   : > { %p609_p3 = pneg %p608_p0 }
  0x1a   : > { %p614_p7 = pnand %p612_p5, %p609_p3 }
  0x1c   : > { %617 = shalt.err (!%p614_p7)
}
  0x1d   : > { %s618_s7 = scalar_lea.vmem %s806_s22, 2048  ;;  %p626_p2 = scmp.lt.s32.totalorder %s806_s22, %s806_s22 }
  0x1e   : > { %p619_p9 = scmp.ne.s32.totalorder %s806_s22, %s618_s7  ;;  %p627_p6 = scmp.lt.s32.totalorder %s618_s7, %s618_s7 }
  0x20   : > { %p621_p10 = pnand %p619_p9, %p607_p13  ;;  %p628_p4 = por %p627_p6, %p626_p2 }
  0x22   : > { %p622_p1 = pneg %p621_p10 }
  0x24   : > { %p629_p8 = pnand %p628_p4, %p622_p1 }
  0x26   : > { %632 = shalt.err (!%p629_p8)
}
  0x27   : > { %s736_s8 = smov 128   ;;  %s737_s9 = smov 8  }
  0x28   : > { %555 = dma.hbm_to_vmem [thread:$0]  (!%p813_p11), %s983_s1, 2048, %s806_s22, [#allocation6], %s736_s8, %s736_s8, %s737_s9  }
  0x29   : > { %p25_p1 = scmp.eq.s32.totalorder %s24_s26, 0  ;;  %p34_p2 = scmp.ne.s32.totalorder %s729_s14, %s725_s13 }
  0x2a   : > { %p35_p4 = scmp.eq.s32.totalorder %s733_s15, 0  ;;  %p565_p6 = scmp.lt.s32.totalorder %s733_s15, 2 }
  0x2b   : > { %s852_s17 = scalar_select %p25_p1, %s729_s14, %s27_s25  }
  0x2c   : > { %p36_p8 = por %p35_p4, %p34_p2  ;;  %p993_p10 = scmp.eq.s32.totalorder %s783_s16, 1 }
  0x2d   : > { %s148_s23 = sand.u32 1, %s729_s14   ;;  %s436_s27 = sshll.u32 %s733_s15, 9 }
  0x2e   : > { %p856_p12 = por %p993_p10, %p34_p2  ;;  %s423_s28 = sshll.u32 %s148_s23, 5 }
  0x2f   : > { %s865_s4 = scalar_lea.hbm %s982_s0, %s436_s27  ;;  %s152_s22 = scalar_lea.vmem [#allocation2], %s423_s28 }
  0x30   : > { %s159_s25 = sshll.u32 %s152_s22, 4  ;;  %p867_p11 = pnand %p565_p6, %p36_p8  ;;  %s871_s25 = int_to_ptr.vmem [resolvable:$true] %s159_s25 }
  0x31   : > { %s873_s5 = scalar_lea.sflag [#allocation3], %s148_s23  ;;  %s633_s6 = scalar_lea.hbm %s865_s4, 512 }
  0x32   : > { %p634_p13 = scmp.ne.s32.totalorder %s865_s4, %s633_s6  ;;  %p635_p0 = pneg %p867_p11 }
  0x33   : > { %s638_s11 = scalar_lea.hbm %s982_s0, 1024  ;;  %p639_p7 = scmp.lt.u32.totalorder %s865_s4, %s982_s0 }
  0x34   : > { %p636_p3 = pnand %p635_p0, %p634_p13  ;;  %p640_p9 = scmp.lt.u32.totalorder %s638_s11, %s633_s6 }
  0x35   : > { %p642_p2 = scmp.lt.u32.totalorder %s633_s6, %s865_s4 }
  0x36   : > { %p637_p5 = pneg %p636_p3  ;;  %p641_p1 = por %p640_p9, %p639_p7 }
  0x38   : > { %p643_p4 = por %p642_p2, %p641_p1 }
  0x3a   : > { %p644_p6 = pnand %p643_p4, %p637_p5 }
  0x3c   : > { %647 = shalt.err (!%p644_p6)
}
  0x3d   : > { %s648_s23 = scalar_lea.vmem %s871_s25, 512  ;;  %s738_s29 = smov [#allocation2]  }
  0x3e   : > { %p649_p8 = scmp.ne.s32.totalorder %s871_s25, %s648_s23  ;;  %s653_s30 = sshll.u32 %s738_s29, 4  ;;  %s654_s30 = int_to_ptr.vmem [resolvable:$false] %s653_s30 }
  0x3f   : > { %s655_s22 = scalar_lea.vmem %s654_s30, 1024  ;;  %p656_p3 = scmp.lt.s32.totalorder %s871_s25, %s654_s30 }
  0x40   : > { %p651_p10 = pnand %p649_p8, %p635_p0  ;;  %p657_p7 = scmp.lt.s32.totalorder %s655_s22, %s648_s23 }
  0x42   : > { %p652_p13 = pneg %p651_p10  ;;  %p658_p9 = por %p657_p7, %p656_p3 }
  0x44   : > { %p659_p1 = pnand %p658_p9, %p652_p13 }
  0x46   : > { %662 = shalt.err (!%p659_p1)
}
  0x47   : > { %559 = dma.hbm_to_vmem [thread:$0]  (!%p867_p11), %s865_s4, 512, %s871_s25, %s873_s5, %s736_s8, %s736_s8, %s737_s9  }
  0x48   : > { %p996_p0 = scmp.ne.s32.totalorder %s991_s20, 0 }
  0x49   : > { %s907_s6 = sand.u32 (!%p996_p0), 1, %s725_s13   ;;  %p997_p5 = scmp.ne.s32.totalorder (!%p996_p0), %s989_s18, 0 }
  0x4a   : > { %171 = sbr.rel (%p996_p0) target bundleno = 350 (0x15e), region = 32  ;;  %s427_s7 = sshll.u32 (!%p996_p0), %s907_s6, 5 }
  0x4b   : > { %s174_s10 = scalar_lea.sflag (!%p996_p0), [#allocation3], %s907_s6  ;;  %s913_s26 = scalar_lea.vmem (!%p996_p0), [#allocation2], %s427_s7 }
  0x51   : > { %708 = dma.done.wait (%p997_p5), %s174_s10, 512  }
  0x52   : > { %710 = vsyncadd (%p997_p5), %s174_s10, 4294966784  ;;  %p998_p11 = scmp.eq.s32.totalorder %s783_s16, 0 }
  0x54   : > { %712 = dma.done.wait (%p998_p11), [#allocation6], 2048   ;;  %p999_p2 = pmov %p998_p11 }
  0x55   : > { %v210_v0 = vld [vmem:[#allocation5] sm:$0xff]  ;;  %v211_v1 = vld [vmem:[#allocation5 + $0x8] sm:$0xff]  ;;  %v212_v2 = vld [vmem:[#allocation5 + $0x10] sm:$0xff]  ;;  %s203_s18 = scalar_lea.vmem [#allocation7], %s427_s7  ;;  %s437_s4 = sshll.u32 %s783_s16, 9 }
  0x56   : > { %714 = vsyncadd (%p999_p2), [#allocation6], 4294965248  ;;  %v496_v3 = vpack.c.bf16 %v211_v1, %v210_v0  ;;  %v213_v4 = vld [vmem:[#allocation5 + $0x18] sm:$0xff]  ;;  %v214_v6 = vld [vmem:[#allocation5 + $0x20] sm:$0xff]  ;;  %s336_s20 = sshll.u32 %s203_s18, 4  ;;  %s938_s11 = scalar_lea.hbm %s985_s3, %s437_s4  ;;  %s933_s20 = int_to_ptr.vmem [resolvable:$true] %s336_s20 }
  0x57   : > { %v500_v5 = vpack.c.bf16 %v213_v4, %v212_v2  ;;  %v215_v7 = vld [vmem:[#allocation5 + $0x28] sm:$0xff]  ;;  %v206_v9 = vld [vmem:[%s913_s26] sm:$0xff]  ;;  %v208_v10 = vld [vmem:[%s913_s26 + $0x10] sm:$0xff]  ;;  %s323_s16 = scalar_lea.sflag [#allocation4], %s907_s6  ;;  %s663_s27 = scalar_lea.vmem %s933_s20, 512 }
  0x58   : > { %497 = vmatprep.subr.bf16.mxu0 %v496_v3  ;;  %528 = vmatprep.subr.bf16.mxu1 %v496_v3  ;;  %v504_v8 = vpack.c.bf16 %v215_v7, %v214_v6  ;;  %v216_v11 = vld [vmem:[#allocation5 + $0x30] sm:$0xff]  ;;  %v217_v12 = vld [vmem:[#allocation5 + $0x38] sm:$0xff]  ;;  %v218_v14 = vld [vmem:[#allocation5 + $0x40] sm:$0xff]  ;;  %p664_p4 = scmp.ne.s32.totalorder %s933_s20, %s663_s27  ;;  %s739_s28 = smov [#allocation7]  }
  0x59   : > { %499 = vmatpush3.bf16.msra.mxu0 %v496_v3  ;;  %536 = vmatpush3.bf16.msra.mxu1 %v496_v3  ;;  %v508_v13 = vpack.c.bf16 %v217_v12, %v216_v11  ;;  %v219_v15 = vld [vmem:[#allocation5 + $0x48] sm:$0xff]  ;;  %v220_v17 = vld [vmem:[#allocation5 + $0x50] sm:$0xff]  ;;  %v221_v18 = vld [vmem:[#allocation5 + $0x58] sm:$0xff]  ;;  %s667_s23 = sshll.u32 %s739_s28, 4  ;;  %s668_s23 = int_to_ptr.vmem [resolvable:$false] %s667_s23 }
  0x5a   : > { %501 = vmatprep.subr.bf16.mxu0 %v500_v5  ;;  %529 = vmatprep.subr.bf16.mxu1 %v500_v5  ;;  %v512_v16 = vpack.c.bf16 %v219_v15, %v218_v14  ;;  %v516_v19 = vpack.c.bf16 %v221_v18, %v220_v17  ;;  %v222_v20 = vld [vmem:[#allocation5 + $0x60] sm:$0xff]  ;;  %v223_v21 = vld [vmem:[#allocation5 + $0x68] sm:$0xff]  ;;  %v224_v23 = vld [vmem:[#allocation5 + $0x70] sm:$0xff]  ;;  %p665_p6 = pnand %p664_p4, %p856_p12  ;;  %s669_s29 = scalar_lea.vmem %s668_s23, 1024 }
  0x5b   : > { %490 = vmatprep.mubr.f32.mxu0 %v206_v9  ;;  %493 = vmatprep.mubr.f32.mxu1 %v208_v10  ;;  %v520_v22 = vpack.c.bf16 %v223_v21, %v222_v20  ;;  %v225_v24 = vld [vmem:[#allocation5 + $0x78] sm:$0xff]  ;;  %v207_v26 = vld [vmem:[%s913_s26 + $0x8] sm:$0xff]  ;;  %v430_v28 = vld [vmem:[%s984_s2] ss:$0 sm:$0xff]  ;;  %p670_p10 = scmp.lt.s32.totalorder %s933_s20, %s668_s23  ;;  %p671_p13 = scmp.lt.s32.totalorder %s669_s29, %s663_s27 }
  0x5c   : > { %v524_v25 = vpack.c.bf16 %v225_v24, %v224_v23  ;;  %v209_v27 = vld [vmem:[%s913_s26 + $0x18] sm:$0xff]  ;;  %p666_p8 = pneg %p665_p6 }
  0x5d   : > { %503 = vmatpush3.bf16.msra.mxu0 %v500_v5  ;;  %537 = vmatpush3.bf16.msra.mxu1 %v500_v5  ;;  %p672_p3 = por %p671_p13, %p670_p10 }
  0x5e   : > { %505 = vmatprep.subr.bf16.mxu0 %v504_v8  ;;  %530 = vmatprep.subr.bf16.mxu1 %v504_v8 }
  0x5f   : > { %p673_p7 = pnand %p672_p3, %p666_p8 }
  0x61   : > { %507 = vmatpush3.bf16.msra.mxu0 %v504_v8  ;;  %538 = vmatpush3.bf16.msra.mxu1 %v504_v8 }
  0x62   : > { %509 = vmatprep.subr.bf16.mxu0 %v508_v13  ;;  %531 = vmatprep.subr.bf16.mxu1 %v508_v13 }
  0x65   : > { %511 = vmatpush3.bf16.msra.mxu0 %v508_v13  ;;  %539 = vmatpush3.bf16.msra.mxu1 %v508_v13 }
  0x66   : > { %513 = vmatprep.subr.bf16.mxu0 %v512_v16  ;;  %532 = vmatprep.subr.bf16.mxu1 %v512_v16 }
  0x69   : > { %515 = vmatpush3.bf16.msra.mxu0 %v512_v16  ;;  %540 = vmatpush3.bf16.msra.mxu1 %v512_v16 }
  0x6a   : > { %517 = vmatprep.subr.bf16.mxu0 %v516_v19  ;;  %533 = vmatprep.subr.bf16.mxu1 %v516_v19 }
  0x6d   : > { %519 = vmatpush3.bf16.msra.mxu0 %v516_v19  ;;  %541 = vmatpush3.bf16.msra.mxu1 %v516_v19 }
  0x6e   : > { %521 = vmatprep.subr.bf16.mxu0 %v520_v22  ;;  %534 = vmatprep.subr.bf16.mxu1 %v520_v22 }
  0x71   : > { %523 = vmatpush3.bf16.msra.mxu0 %v520_v22  ;;  %542 = vmatpush3.bf16.msra.mxu1 %v520_v22 }
  0x72   : > { %525 = vmatprep.subr.bf16.mxu0 %v524_v25  ;;  %535 = vmatprep.subr.bf16.mxu1 %v524_v25 }
  0x75   : > { %527 = vmatpush3.bf16.msra.mxu0 %v524_v25  ;;  %543 = vmatpush3.bf16.msra.mxu1 %v524_v25 }
  0x78   : > { %491 = vmatmul.mubr.f32.vlgmr.msra.gmra.mrb[0].mxu0 %v207_v26  ;;  %494 = vmatmul.mubr.f32.vlgmr.msra.gmra.mrb[0].mxu1 %v209_v27 }
 0x14b   : > { %v492_v29 = vpop.f32.mrb[0].mxu0  ;;  %v495_v30 = vpop.f32.mrb[0].mxu1 }
 0x14c   : > { %v305_v31 = vadd.f32 %v492_v29, %v430_v28  ;;  %v315_v32 = vadd.f32 %v495_v30, %v430_v28  ;;  %v299_v33 = vpop.f32.mrb[1].mxu0  ;;  %v309_v34 = vpop.f32.mrb[1].mxu1 }
 0x14d   : > { %v300_v35 = vadd.f32 %v430_v28, %v299_v33  ;;  %v310_v36 = vadd.f32 %v430_v28, %v309_v34 }
 0x14e   : > { %319 = vst [vmem:[%s203_s18 + $0x8] sm:$0xff] %v305_v31  ;;  %321 = vst [vmem:[%s203_s18 + $0x18] sm:$0xff] %v315_v32 }
 0x14f   : > { %318 = vst [vmem:[%s203_s18] sm:$0xff] %v300_v35  ;;  %320 = vst [vmem:[%s203_s18 + $0x10] sm:$0xff] %v310_v36 }
 0x150   : > { %676 = shalt.err (!%p673_p7)
}
 0x151   : > { %s677_s30 = scalar_lea.hbm %s938_s11, 512  ;;  %s681_s10 = scalar_lea.hbm %s985_s3, 1024 }
 0x152   : > { %p678_p9 = scmp.ne.s32.totalorder %s938_s11, %s677_s30  ;;  %p682_p5 = scmp.lt.u32.totalorder %s938_s11, %s985_s3 }
 0x153   : > { %p683_p11 = scmp.lt.u32.totalorder %s681_s10, %s677_s30  ;;  %p685_p4 = scmp.lt.u32.totalorder %s677_s30, %s938_s11 }
 0x154   : > { %p679_p1 = pnand %p678_p9, %p856_p12 }
 0x155   : > { %p684_p2 = por %p683_p11, %p682_p5 }
 0x156   : > { %p680_p0 = pneg %p679_p1 }
 0x157   : > { %p686_p6 = por %p685_p4, %p684_p2 }
 0x159   : > { %p687_p8 = pnand %p686_p6, %p680_p0 }
 0x15b   : > { %690 = shalt.err (!%p687_p8)
}
 0x15c   : > { %s740_s8 = smov 128   ;;  %s741_s9 = smov 8  }
 0x15d   : > { %550 = dma.vmem_to_hbm [thread:$0]  (%p856_p12), %s933_s20, 512, %s938_s11, %s323_s16, %s740_s8, %s740_s8, %s741_s9  }
 0x15e PF: > { %s351_s4 = sand.u32 1, %s721_s12   ;;  %p1000_p10 = scmp.ne.s32.totalorder %s990_s19, 0 }
 0x15f   : > { %p1001_p13 = scmp.ge.s32.totalorder %s733_s15, 2  ;;  %s352_s25 = scalar_lea.sflag [#allocation4], %s351_s4 }
 0x161   : > { %p561_p3 = pnand %p1001_p13, %p1000_p10 }
 0x163   : > { %716 = dma.done.wait (!%p561_p3), %s352_s25, 512  }
 0x164   : > { %718 = vsyncadd (!%p561_p3), %s352_s25, 4294966784  ;;  %p17_p7 = scmp.ge.s32.totalorder %s818_s24, 4   ;;  %s1002_s12 = smov %s725_s13 }
 0x165   : > { %s1003_s13 = smov %s729_s14  ;;  %s1004_s14 = smov %s852_s17 }
 0x166   : > { %s1005_s15 = smov %s818_s24  ;;  %19 = sbr.rel (!%p17_p7) target bundleno = 6 (0x6), region = 81 }
 0x16d   :  { %357 = vsyncpa [#allocation3], 1 }
 0x16e   :  { %359 = vsyncpa [#allocation3 + $0x1], 1 }
 0x16f   :  { %360 = vsyncpa [#allocation6], 1 }
 0x170   :  { %361 = vsyncpa [#allocation4], 1 }
 0x171   :  { %363 = vsyncpa [#allocation4 + $0x1], 1 }

</bundles_post_ra>
